<compile_context>
chip_gen: v7x
topology: tpu7x:2x2x1
jax: 0.10.0
libtpu: 0.0.40
codegen_flags: <defaults>
</compile_context>

<pallas_src>
import functools
import math

import jax
import jax.numpy as jnp
from jax.experimental import pallas as pl
from jax.experimental.pallas import tpu as pltpu


def _round_up(x, m):
    return (x + m - 1) // m * m


def _largest_dividing_tile(dim, cap, align=128):
    """Largest multiple of `align` that divides `dim` and is <= min(cap, dim).

    `dim` must be a positive multiple of `align` (so `align` always qualifies).
    """
    best = align
    for mult in range(1, min(cap, dim) // align + 1):
        t = mult * align
        if dim % t == 0:
            best = t
    return best


def _vmem_cap_bytes():
    # Generation-aware VMEM ceiling: ~75% of physical.
    # v5e/v6e: 128 MiB -> ~96 MiB;  v7x: 64 MiB -> ~48 MiB.
    try:
        phys = pltpu.get_tpu_info().vmem_capacity_bytes
    except Exception:
        phys = 64 * 1024 * 1024  # conservative (v7x) fallback
    return int(phys * 3 // 4)


# ----------------------------- kernels --------------------------------------


def _linear_kernel_acc(x_ref, w_ref, b_ref, o_ref, acc_ref):
    """Multi-K-step variant: f32 accumulator across the K grid axis."""
    k = pl.program_id(2)

    @pl.when(k == 0)
    def _init():
        acc_ref[...] = jnp.zeros_like(acc_ref)

    # Cast the activation tile to the weight dtype (bf16 by default) on the
    # VPU so the MXU runs at bf16 throughput; accumulate in f32.
    acc_ref[...] += jnp.dot(
        x_ref[...].astype(w_ref.dtype), w_ref[...],
        preferred_element_type=jnp.float32)

    @pl.when(k == pl.num_programs(2) - 1)
    def _finalize():
        # Bias added exactly once, at the final K step.
        o_ref[...] = (acc_ref[...] + b_ref[...].astype(jnp.float32)).astype(
            o_ref.dtype)


def _linear_kernel_single_k(x_ref, w_ref, b_ref, o_ref):
    """Single-K-step fast path: no accumulator scratch, no phase gating."""
    acc = jnp.dot(x_ref[...].astype(w_ref.dtype), w_ref[...],
                  preferred_element_type=jnp.float32)
    o_ref[...] = (acc + b_ref[...].astype(jnp.float32)).astype(o_ref.dtype)


# ----------------------------- wrapper ---------------------------------------


@functools.partial(jax.jit, static_argnames=("out_dim", "tm", "tn", "tk"))
def side_layer_forward(x, w_p, b_p, *, out_dim, tm=None, tn=None, tk=None):
    """Forward of SideLayer:  y = x @ W^T + b.

    x:   (B, in_dim) activations (f32).
    w_p: (K_pad, N_pad) weight, already transposed / zero-padded to 128
         multiples / cast to the compute dtype at init time.
    b_p: (1, N_pad) bias, zero-padded, f32.
    """
    B, in_dim = x.shape
    K_pad, N_pad = w_p.shape
    assert K_pad >= in_dim and K_pad % 128 == 0 and N_pad % 128 == 0
    assert b_p.shape == (1, N_pad)
    assert out_dim <= N_pad

    # ---- tile selection ------------------------------------------------
    tn_user = tn is not None
    if tk is None:
        tk = _largest_dividing_tile(K_pad, 2048, 128)
    if tn is None:
        tn = _largest_dividing_tile(N_pad, 512, 128)
    if tm is None:
        # Cover the batch with as few M tiles as possible (weight is replayed
        # from HBM once per M tile), and balance awkward batch sizes so M
        # padding stays under one tile.
        tm_max = 512
        n_m_tiles = -(-B // tm_max)
        tm = _round_up(-(-B // n_m_tiles), 8)
    M_pad = _round_up(B, tm)

    # v7x megacore: guarantee >=2 blocks along a "parallel" axis when possible
    # so both TensorCores get work. Splitting N adds no HBM traffic.
    if (M_pad // tm) == 1 and (N_pad // tn) == 1 and not tn_user and N_pad >= 256:
        tn = _largest_dividing_tile(N_pad, N_pad // 2, 128)

    grid_m, grid_n, grid_k = M_pad // tm, N_pad // tn, K_pad // tk

    # Only the activations may need per-call padding (weight/bias were padded
    # once at init). Zero-padding along K is benign; M/N padding is sliced off.
    if M_pad != B or K_pad != in_dim:
        x_p = jnp.pad(x, ((0, M_pad - B), (0, K_pad - in_dim)))
    else:
        x_p = x

    out_dtype = x.dtype

    # ---- VMEM budget from the real per-buffer dtypes ---------------------
    x_it = jnp.dtype(x.dtype).itemsize
    w_it = jnp.dtype(w_p.dtype).itemsize
    b_it = jnp.dtype(b_p.dtype).itemsize
    o_it = jnp.dtype(out_dtype).itemsize
    vmem_need = (2 * tm * tk * x_it          # x tiles (double-buffered)
                 + 2 * tk * tn * w_it        # weight tiles (double-buffered)
                 + 2 * 1 * tn * b_it         # bias tiles
                 + 2 * tm * tn * o_it        # output tiles
                 + (tm * tn * 4 if grid_k > 1 else 0))   # f32 accumulator
    vmem_limit = int(min(max(2 * vmem_need, 16 * 1024 * 1024), _vmem_cap_bytes()))

    cost = pl.CostEstimate(
        flops=2 * M_pad * N_pad * K_pad,
        bytes_accessed=(M_pad * K_pad * x_it
                        + grid_m * K_pad * N_pad * w_it  # weight re-streamed / M tile
                        + N_pad * b_it
                        + M_pad * N_pad * o_it),
        transcendentals=0,
    )

    if grid_k == 1:
        # Single K step (in_dim fits one tk tile): no accumulator needed.
        out_padded = pl.pallas_call(
            _linear_kernel_single_k,
            out_shape=jax.ShapeDtypeStruct((M_pad, N_pad), out_dtype),
            grid=(grid_m, grid_n),
            in_specs=[
                pl.BlockSpec((tm, tk), lambda i, j: (i, 0)),
                # TODO(synk): if a bundle dump shows exposed weight DMA after
                # enlarging tiles, add pipeline_mode=pl.Buffered(3) here.
                pl.BlockSpec((tk, tn), lambda i, j: (0, j)),
                pl.BlockSpec((1, tn), lambda i, j: (0, j)),
            ],
            out_specs=pl.BlockSpec((tm, tn), lambda i, j: (i, j)),
            compiler_params=pltpu.CompilerParams(
                dimension_semantics=("parallel", "parallel"),
                vmem_limit_bytes=vmem_limit),
            cost_estimate=cost,
        )(x_p, w_p, b_p)
    else:
        out_padded = pl.pallas_call(
            _linear_kernel_acc,
            out_shape=jax.ShapeDtypeStruct((M_pad, N_pad), out_dtype),
            grid=(grid_m, grid_n, grid_k),
            in_specs=[
                pl.BlockSpec((tm, tk), lambda i, j, k: (i, k)),
                pl.BlockSpec((tk, tn), lambda i, j, k: (k, j)),
                pl.BlockSpec((1, tn), lambda i, j, k: (0, j)),
            ],
            out_specs=pl.BlockSpec((tm, tn), lambda i, j, k: (i, j)),
            scratch_shapes=[pltpu.VMEM((tm, tn), jnp.float32)],
            compiler_params=pltpu.CompilerParams(
                dimension_semantics=("parallel", "parallel", "arbitrary"),
                vmem_limit_bytes=vmem_limit),
            cost_estimate=cost,
        )(x_p, w_p, b_p)

    if M_pad == B and N_pad == out_dim:
        return out_padded
    return out_padded[:B, :out_dim]


# ----------------------------- param prep ------------------------------------


def init_side_layer_params(key, in_dim, out_dim, compute_dtype=jnp.bfloat16):
    """Matches SideLayer.__init__:
       - weight: xavier_uniform_, shape (out_dim, in_dim)  (PyTorch layout)
       - bias:   nn.Linear default uniform(-1/sqrt(in_dim), 1/sqrt(in_dim))

    One-time layout work (so the per-call forward never rewrites the weight in
    HBM): transpose to (in_dim, out_dim), zero-pad both dims to multiples of
    128, cast to `compute_dtype` (bf16 by default; f32 accumulation in-kernel).
    """
    kw, kb = jax.random.split(key)
    limit_w = math.sqrt(6.0 / (in_dim + out_dim))  # xavier uniform, gain=1
    weight = jax.random.uniform(kw, (out_dim, in_dim), jnp.float32,
                                minval=-limit_w, maxval=limit_w)
    limit_b = 1.0 / math.sqrt(in_dim)
    bias = jax.random.uniform(kb, (out_dim,), jnp.float32,
                              minval=-limit_b, maxval=limit_b)

    K_pad = _round_up(in_dim, 128)
    N_pad = _round_up(out_dim, 128)
    w_padded = jnp.zeros((K_pad, N_pad), compute_dtype).at[:in_dim, :out_dim].set(
        weight.T.astype(compute_dtype))
    b_padded = jnp.zeros((1, N_pad), jnp.float32).at[0, :out_dim].set(bias)

    return {"weight": weight, "bias": bias,
            "w_padded": w_padded, "b_padded": b_padded, "out_dim": out_dim}


# ----------------------------- self-test --------------------------------------


if __name__ == "__main__":
    key = jax.random.PRNGKey(0)
    k_x, k_p = jax.random.split(key)

    # Small shapes consistent with the module (a standalone Linear layer).
    batch, in_dim, out_dim = 8, 32, 16
    x = jax.random.normal(k_x, (batch, in_dim), dtype=jnp.float32)
    p = init_side_layer_params(k_p, in_dim, out_dim)

    out = jax.block_until_ready(
        side_layer_forward(x, p["w_padded"], p["b_padded"], out_dim=out_dim))
    assert out.shape == (batch, out_dim)

    # Tight check vs a bf16-input / f32-accumulate reference, loose vs pure f32.
    ref_bf16 = (jnp.dot(x.astype(jnp.bfloat16), p["weight"].T.astype(jnp.bfloat16),
                        preferred_element_type=jnp.float32) + p["bias"])
    ref_f32 = x @ p["weight"].T + p["bias"]
    assert jnp.allclose(out, ref_bf16, atol=5e-3, rtol=5e-3)
    assert jnp.allclose(out, ref_f32, atol=5e-2, rtol=5e-2)

    # Shape needing multiple N tiles (exercises the >=2-parallel-blocks split),
    # still a single K step.
    B2, D2, O2 = 192, 640, 384
    kx2, kp2 = jax.random.split(jax.random.PRNGKey(1))
    x2 = jax.random.normal(kx2, (B2, D2), dtype=jnp.float32)
    p2 = init_side_layer_params(kp2, D2, O2)
    out2 = jax.block_until_ready(
        side_layer_forward(x2, p2["w_padded"], p2["b_padded"], out_dim=O2))
    ref2_bf16 = (jnp.dot(x2.astype(jnp.bfloat16),
                         p2["weight"].T.astype(jnp.bfloat16),
                         preferred_element_type=jnp.float32) + p2["bias"])
    ref2_f32 = x2 @ p2["weight"].T + p2["bias"]
    assert out2.shape == (B2, O2)
    assert jnp.allclose(out2, ref2_bf16, atol=1e-2, rtol=1e-2)
    assert jnp.allclose(out2, ref2_f32, atol=1e-1, rtol=5e-2)

    # Force multiple K steps (tk=128 -> 5 steps) to exercise the accumulator
    # kernel variant.
    out3 = jax.block_until_ready(
        side_layer_forward(x2, p2["w_padded"], p2["b_padded"], out_dim=O2, tk=128))
    assert jnp.allclose(out3, ref2_bf16, atol=1e-2, rtol=1e-2)

    # f32 compute-dtype path (smoke test with loose tolerance).
    p4 = init_side_layer_params(kp2, D2, O2, compute_dtype=jnp.float32)
    out4 = jax.block_until_ready(
        side_layer_forward(x2, p4["w_padded"], p4["b_padded"], out_dim=O2))
    assert jnp.allclose(out4, ref2_f32, atol=5e-2, rtol=5e-2)

    print("KERNEL_OK")
</pallas_src>

<mosaic_0001>
module attributes {stable_mosaic.version = 11 : i64} {
  func.func @_linear_kernel_single_k(%arg0: i32, %arg1: i32, %arg2: memref<8x128xf32, #tpu.memory_space<vmem>>, %arg3: memref<128x128xbf16, #tpu.memory_space<vmem>>, %arg4: memref<1x128xf32, #tpu.memory_space<vmem>>, %arg5: memref<8x128xf32, #tpu.memory_space<vmem>>) attributes {dimension_semantics = [#tpu.dimension_semantics<parallel>, #tpu.dimension_semantics<parallel>], iteration_bounds = array<i64: 1, 1>, scalar_prefetch = 0 : i64, scratch_operands = 0 : i64, tpu.core_type = #tpu.core_type<tc>, window_params = [{transform_indices = @transform_0, window_bounds = array<i64: 8, 128>}, {transform_indices = @transform_1, window_bounds = array<i64: 128, 128>}, {transform_indices = @transform_2, window_bounds = array<i64: 1, 128>}, {transform_indices = @transform_3, window_bounds = array<i64: 8, 128>}]} {
    %c0 = arith.constant 0 : index
    %c0_0 = arith.constant 0 : index
    %0 = vector.load %arg2[%c0, %c0_0] : memref<8x128xf32, #tpu.memory_space<vmem>>, vector<8x128xf32>
    %1 = arith.truncf %0 : vector<8x128xf32> to vector<8x128xbf16>
    %c0_1 = arith.constant 0 : index
    %c0_2 = arith.constant 0 : index
    %2 = vector.load %arg3[%c0_1, %c0_2] : memref<128x128xbf16, #tpu.memory_space<vmem>>, vector<128x128xbf16>
    %cst = arith.constant dense<0.000000e+00> : vector<8x128xf32>
    %3 = tpu.matmul %1, %2, %cst {dimension_numbers = #tpu.dot_dimension_numbers<[1], [0], [0], [1], [0, 0, 1, 1], [], []>} : vector<8x128xbf16>, vector<128x128xbf16>, vector<8x128xf32> -> vector<8x128xf32>
    %c0_3 = arith.constant 0 : index
    %c0_4 = arith.constant 0 : index
    %4 = vector.load %arg4[%c0_3, %c0_4] : memref<1x128xf32, #tpu.memory_space<vmem>>, vector<1x128xf32>
    %5 = vector.broadcast %4 : vector<1x128xf32> to vector<8x128xf32>
    %6 = arith.addf %3, %5 : vector<8x128xf32>
    %c0_5 = arith.constant 0 : index
    %c0_6 = arith.constant 0 : index
    %7 = vector.load %arg5[%c0_5, %c0_6] : memref<8x128xf32, #tpu.memory_space<vmem>>, vector<8x128xf32>
    tpu.vector_store %arg5[%c0_5, %c0_6], %6 {strides = array<i32>} : memref<8x128xf32, #tpu.memory_space<vmem>>, vector<8x128xf32>,
    return
  }
  func.func @transform_0(%arg0: i32, %arg1: i32) -> (i32, i32) {
    %c0_i32 = arith.constant 0 : i32
    %c0_i32_0 = arith.constant 0 : i32
    return %arg0, %c0_i32 : i32, i32
  }
  func.func @transform_1(%arg0: i32, %arg1: i32) -> (i32, i32) {
    %c0_i32 = arith.constant 0 : i32
    %c0_i32_0 = arith.constant 0 : i32
    return %c0_i32, %arg1 : i32, i32
  }
  func.func @transform_2(%arg0: i32, %arg1: i32) -> (i32, i32) {
    %c0_i32 = arith.constant 0 : i32
    %c0_i32_0 = arith.constant 0 : i32
    return %c0_i32, %arg1 : i32, i32
  }
  func.func @transform_3(%arg0: i32, %arg1: i32) -> (i32, i32) {
    %c0_i32 = arith.constant 0 : i32
    return %arg0, %arg1 : i32, i32
  }
}

</mosaic_0001>

<bundles_post_ra>
// kernel: side_layer_forward.1
= control target key start
LH: loop header
LB: loop body
LE: loop exit
PB: predicated region body
PF: predicated region fallthrough
CT: control target
= control target key end

     0   :  { %8 = vsyncpa [#allocation3], 0  ;;  %s315_s0 = inlined_call_operand.vmem [shape: f32[8,128], index: 0, kind: input, shape index: {}]   ;;  %s316_s1 = inlined_call_operand.hbm [shape: bf16[128,128], index: 1, kind: input, shape index: {}]   ;;  %s317_s2 = inlined_call_operand.vmem [shape: f32[1,128], index: 2, kind: input, shape index: {}]   ;;  %s318_s3 = inlined_call_operand.hbm [shape: f32[8,128], index: 3, kind: output, shape index: {}]  }
   0x1   :  { %9 = vsyncpa [#allocation4], 0  ;;  %s259_s12 = smov [#allocation2]   ;;  %s211_s16 = scalar_lea.hbm %s316_s1, 1024 }
   0x2   :  { %s17_s13 = sshll.u32 %s259_s12, 4  ;;  %p212_p0 = scmp.ne.s32.totalorder %s316_s1, %s211_s16  ;;  %s18_s13 = int_to_ptr.vmem [resolvable:$true] %s17_s13 }
   0x3   :  { %p215_p1 = scmp.lt.u32.totalorder %s211_s16, %s316_s1 }
   0x5   :  { %p217_p2 = pnand %p215_p1, %p212_p0 }
   0x7   :  { %220 = shalt.err (!%p217_p2)
}
   0x8   :  { %s221_s21 = scalar_lea.vmem %s18_s13, 1024  ;;  %p226_p4 = scmp.lt.s32.totalorder %s18_s13, %s18_s13 }
   0x9   :  { %p222_p3 = scmp.ne.s32.totalorder %s18_s13, %s221_s21  ;;  %p227_p5 = scmp.lt.s32.totalorder %s221_s21, %s221_s21 }
   0xb   :  { %p228_p6 = por %p227_p5, %p226_p4 }
   0xd   :  { %p229_p7 = pnand %p228_p6, %p222_p3 }
   0xf   :  { %232 = shalt.err (!%p229_p7)
}
  0x10   :  { %s260_s22 = smov 64   ;;  %s261_s23 = smov 4  }
  0x11   :  { %23 = dma.hbm_to_vmem [thread:$0]  %s316_s1, 1024, %s18_s13, [#allocation3], %s260_s22, %s260_s22, %s261_s23  }
  0x12   :  { %255 = dma.done.wait [#allocation3], 1024  }
  0x13   :  { %256 = vsyncadd [#allocation3], 4294966272  ;;  %v262_v0 = vmov 0.0   ;;  %vm263_vm0 = vmmov 0   ;;  %v203_v1 = vld [vmem:[#allocation2] sm:$0xff]   ;;  %v204_v2 = vld [vmem:[#allocation2 + $0x8] sm:$0xff]  }
  0x14   :  { %177 = vmatprep.subr.bf16.mxu0 %v262_v0  ;;  %193 = vmatprep.mubr.msk.bf16.mxu0 %vm263_vm0, %v262_v0  ;;  %v205_v3 = vld [vmem:[#allocation2 + $0x10] sm:$0xff]   ;;  %v206_v4 = vld [vmem:[#allocation2 + $0x18] sm:$0xff]   ;;  %v207_v5 = vld [vmem:[#allocation2 + $0x20] sm:$0xff]   ;;  %s264_s29 = smov [#allocation5]  }
  0x15   :  { %178 = vmatpush3.bf16.msra.mxu0 %v203_v1  ;;  %v208_v6 = vld [vmem:[#allocation2 + $0x28] sm:$0xff]   ;;  %v209_v7 = vld [vmem:[#allocation2 + $0x30] sm:$0xff]   ;;  %v210_v8 = vld [vmem:[#allocation2 + $0x38] sm:$0xff]   ;;  %s150_s30 = sshll.u32 %s264_s29, 4  ;;  %s151_s30 = int_to_ptr.vmem [resolvable:$true] %s150_s30 }
  0x16   :  { %179 = vmatprep.subr.bf16.mxu0 %v262_v0  ;;  %v30_v9 = vld [vmem:[%s315_s0] sm:$0xff]  ;;  %s233_s4 = scalar_lea.vmem %s151_s30, 128  ;;  %p238_p9 = scmp.lt.s32.totalorder %s151_s30, %s151_s30 }
  0x17   :  { %v31_v10 = vpack.c.bf16 %v30_v9, %v30_v9  ;;  %v159_v11 = vld [vmem:[%s317_s2] ss:$0 sm:$0xff]  ;;  %p234_p8 = scmp.ne.s32.totalorder %s151_s30, %s233_s4  ;;  %p239_p10 = scmp.lt.s32.totalorder %s233_s4, %s233_s4 }
  0x19   :  { %180 = vmatpush3.bf16.msra.mxu0 %v204_v2  ;;  %p240_p11 = por %p239_p10, %p238_p9 }
  0x1a   :  { %181 = vmatprep.subr.bf16.mxu0 %v262_v0 }
  0x1b   :  { %p241_p12 = pnand %p240_p11, %p234_p8 }
  0x1d   :  { %182 = vmatpush3.bf16.msra.mxu0 %v205_v3 }
  0x1e   :  { %183 = vmatprep.subr.bf16.mxu0 %v262_v0 }
  0x21   :  { %184 = vmatpush3.bf16.msra.mxu0 %v206_v4 }
  0x22   :  { %185 = vmatprep.subr.bf16.mxu0 %v262_v0 }
  0x25   :  { %186 = vmatpush3.bf16.msra.mxu0 %v207_v5 }
  0x26   :  { %187 = vmatprep.subr.bf16.mxu0 %v262_v0 }
  0x29   :  { %188 = vmatpush3.bf16.msra.mxu0 %v208_v6 }
  0x2a   :  { %189 = vmatprep.subr.bf16.mxu0 %v262_v0 }
  0x2d   :  { %190 = vmatpush3.bf16.msra.mxu0 %v209_v7 }
  0x2e   :  { %191 = vmatprep.subr.bf16.mxu0 %v262_v0 }
  0x31   :  { %192 = vmatpush3.bf16.msra.mxu0 %v210_v8 }
  0x34   :  { %194 = vmatmul.mubr.bf16.vlgmr.msra.gmra.mrb[0].mxu0 %v31_v10 }
 0x107   :  { %v137_v12 = vpop.f32.mrb[0].mxu0 }
 0x108   :  { %v138_v13 = vadd.f32 %v159_v11, %v137_v12  ;;  %v195_v14 = vpop.f32.mrb[1].mxu0 }
 0x109   :  { %v140_v15 = vpop.f32.mrb[2].mxu0 }
 0x10a   :  { %143 = vst [vmem:[#allocation5] sm:$0xff] %v138_v13  ;;  %v196_v16 = vpop.f32.mrb[3].mxu0 }
 0x10b   :  { %244 = shalt.err (!%p241_p12)
}
 0x10c   :  { %s245_s2 = scalar_lea.hbm %s318_s3, 128 }
 0x10d   :  { %p246_p13 = scmp.ne.s32.totalorder %s318_s3, %s245_s2  ;;  %p249_p0 = scmp.lt.u32.totalorder %s245_s2, %s318_s3 }
 0x10f   :  { %p251_p1 = pnand %p249_p0, %p246_p13 }
 0x111   :  { %254 = shalt.err (!%p251_p1)
}
 0x112   :  { %153 = dma.vmem_to_hbm [thread:$0]  %s151_s30, 128, %s318_s3, [#allocation4]  }
 0x113   :  { %257 = dma.done.wait [#allocation4], 128  }
 0x114   :  { %258 = vsyncadd [#allocation4], 4294967168 }
 0x115   :  { %157 = vsyncpa [#allocation3], 1 }
 0x116   :  { %158 = vsyncpa [#allocation4], 1 }

</bundles_post_ra>
